<compile_context>
chip_gen: v7x
topology: tpu7x:2x2x1
jax: 0.10.0
libtpu: 0.0.40
codegen_flags: <defaults>
</compile_context>

<pallas_src>
import functools
import math

import jax
import jax.numpy as jnp
from jax import lax
from jax.experimental import pallas as pl
from jax.experimental.pallas import tpu as pltpu


def _layer_norm(v, w, b, eps=1e-5):
    """torch.nn.LayerNorm semantics (biased variance, eps inside sqrt)."""
    mu = jnp.mean(v, axis=-1, keepdims=True)
    d = v - mu
    var = jnp.mean(d * d, axis=-1, keepdims=True)
    return d * lax.rsqrt(var + eps) * w + b


def _encoder_kernel(x_ref, ln1_w_ref, ln1_b_ref, wqkv_ref, wproj_ref,
                    bproj_ref, ln2_w_ref, ln2_b_ref, wfc1_ref, bfc1_ref,
                    wfc2_ref, bfc2_ref, o_ref, *, num_heads, head_size):
    x = x_ref[0].astype(jnp.float32)                       # (T, C)
    T, C = x.shape

    # ---- x + MultiHeadAttention(LayerNorm1(x)) -----------------------------
    h = _layer_norm(x, ln1_w_ref[...], ln1_b_ref[...])     # (T, C)

    # Fused QKV projection: one dense matmul instead of 3*H tiny ones.
    qkv = jnp.dot(h, wqkv_ref[...],
                  preferred_element_type=jnp.float32)      # (T, 3C)

    scale = C ** -0.5                                      # torch: C ** (-0.5)
    head_outs = []
    for hd in range(num_heads):
        q = qkv[:, hd * head_size:(hd + 1) * head_size]                 # (T, hs)
        k = qkv[:, C + hd * head_size:C + (hd + 1) * head_size]         # (T, hs)
        v = qkv[:, 2 * C + hd * head_size:2 * C + (hd + 1) * head_size]  # (T, hs)
        # q @ k.T with the transpose absorbed into the MXU contraction.
        s = lax.dot_general(q, k, (((1,), (1,)), ((), ())),
                            preferred_element_type=jnp.float32) * scale  # (T, T)
        s = s - jnp.max(s, axis=-1, keepdims=True)
        p = jnp.exp(s)
        p = p * pl.reciprocal(jnp.sum(p, axis=-1, keepdims=True), approx=True)
        # TODO(synk): attention-weight dropout omitted (identity at inference).
        head_outs.append(jnp.dot(p, v, preferred_element_type=jnp.float32))
    att = jnp.concatenate(head_outs, axis=-1)              # (T, C) == torch.cat(dim=-1)

    sa = jnp.dot(att, wproj_ref[...],
                 preferred_element_type=jnp.float32) + bproj_ref[...]
    # TODO(synk): projection dropout omitted (identity at inference).
    x1 = x + sa

    # ---- x1 + FeedForward(LayerNorm2(x1)) ----------------------------------
    h2 = _layer_norm(x1, ln2_w_ref[...], ln2_b_ref[...])
    f = jnp.dot(h2, wfc1_ref[...],
                preferred_element_type=jnp.float32) + bfc1_ref[...]
    f = jnp.maximum(f, 0.0)                                # ReLU
    f = jnp.dot(f, wfc2_ref[...],
                preferred_element_type=jnp.float32) + bfc2_ref[...]
    # TODO(synk): feed-forward dropout omitted (identity at inference).

    o_ref[...] = (x1 + f)[None].astype(o_ref.dtype)


def encoder_forward(x, params, *, num_heads, head_size):
    """x: (B, T, C).  Weights pre-transposed so every layer computes x @ W."""
    B, T, C = x.shape
    C4 = 4 * C

    kernel = functools.partial(_encoder_kernel, num_heads=num_heads,
                               head_size=head_size)

    const = lambda b: (0, 0)   # same block every grid step -> weights DMA'd once

    return pl.pallas_call(
        kernel,
        out_shape=jax.ShapeDtypeStruct((B, T, C), x.dtype),
        grid_spec=pltpu.PrefetchScalarGridSpec(
            num_scalar_prefetch=0,
            grid=(B,),
            in_specs=[
                pl.BlockSpec((1, T, C), lambda b: (b, 0, 0)),   # x
                pl.BlockSpec((1, C), const),                    # ln1 gamma
                pl.BlockSpec((1, C), const),                    # ln1 beta
                pl.BlockSpec((C, 3 * C), const),                # fused W_qkv
                pl.BlockSpec((C, C), const),                    # W_proj
                pl.BlockSpec((1, C), const),                    # b_proj
                pl.BlockSpec((1, C), const),                    # ln2 gamma
                pl.BlockSpec((1, C), const),                    # ln2 beta
                pl.BlockSpec((C, C4), const),                   # W_fc1
                pl.BlockSpec((1, C4), const),                   # b_fc1
                pl.BlockSpec((C4, C), const),                   # W_fc2
                pl.BlockSpec((1, C), const),                    # b_fc2
            ],
            out_specs=pl.BlockSpec((1, T, C), lambda b: (b, 0, 0)),
        ),
        compiler_params=pltpu.CompilerParams(
            # "parallel" lets v7x split the batch axis across its 2 TensorCores;
            # on v5e/v6e (1 TC) it is just a short serial loop.
            dimension_semantics=("parallel",)),
    )(x, params["ln1_w"], params["ln1_b"], params["w_qkv"],
      params["w_proj"], params["b_proj"], params["ln2_w"], params["ln2_b"],
      params["w_fc1"], params["b_fc1"], params["w_fc2"], params["b_fc2"])


# ----------------------------------------------------------------------------
# Pure-JAX reference (mirrors the PyTorch Encoder forward exactly).
# ----------------------------------------------------------------------------
def reference(x, params, *, num_heads, head_size):
    C = x.shape[-1]

    def ln(v, w, b):
        mu = jnp.mean(v, axis=-1, keepdims=True)
        var = jnp.mean((v - mu) ** 2, axis=-1, keepdims=True)
        return (v - mu) / jnp.sqrt(var + 1e-5) * w + b

    h = ln(x, params["ln1_w"][0], params["ln1_b"][0])
    wqkv = params["w_qkv"]
    outs = []
    for hd in range(num_heads):
        wq = wqkv[:, hd * head_size:(hd + 1) * head_size]
        wk = wqkv[:, C + hd * head_size:C + (hd + 1) * head_size]
        wv = wqkv[:, 2 * C + hd * head_size:2 * C + (hd + 1) * head_size]
        q, k, v = h @ wq, h @ wk, h @ wv
        wei = (q @ jnp.swapaxes(k, -2, -1)) * (C ** -0.5)
        wei = jax.nn.softmax(wei, axis=-1)
        outs.append(wei @ v)
    att = jnp.concatenate(outs, axis=-1)
    sa = att @ params["w_proj"] + params["b_proj"][0]
    x1 = x + sa
    h2 = ln(x1, params["ln2_w"][0], params["ln2_b"][0])
    f = jnp.maximum(h2 @ params["w_fc1"] + params["b_fc1"][0], 0.0)
    f = f @ params["w_fc2"] + params["b_fc2"][0]
    return x1 + f


if __name__ == "__main__":
    B, T = 2, 8
    num_heads, head_size = 4, 8
    n_embd = num_heads * head_size          # 32

    key = jax.random.PRNGKey(0)
    keys = jax.random.split(key, 12)

    x = jax.random.normal(keys[0], (B, T, n_embd), dtype=jnp.float32)

    b_in = 1.0 / math.sqrt(n_embd)          # Linear(in=C) init bound
    b_fc2 = 1.0 / math.sqrt(4 * n_embd)     # Linear(in=4C) init bound
    u = lambda k, shape, bound: jax.random.uniform(
        k, shape, minval=-bound, maxval=bound, dtype=jnp.float32)

    params = {
        # LayerNorm affine params, kept 2D (1, C) for clean lane layout.
        "ln1_w": 1.0 + 0.1 * jax.random.normal(keys[1], (1, n_embd), jnp.float32),
        "ln1_b": 0.1 * jax.random.normal(keys[2], (1, n_embd), jnp.float32),
        "ln2_w": 1.0 + 0.1 * jax.random.normal(keys[3], (1, n_embd), jnp.float32),
        "ln2_b": 0.1 * jax.random.normal(keys[4], (1, n_embd), jnp.float32),
        # Fused QKV weight, pre-transposed (y = x @ W): columns [0:C]=Q heads,
        # [C:2C]=K heads, [2C:3C]=V heads, head h at [h*hs:(h+1)*hs].
        "w_qkv": u(keys[5], (n_embd, 3 * n_embd), b_in),
        # Output projection (pre-transposed) + bias.
        "w_proj": u(keys[6], (n_embd, n_embd), b_in),
        "b_proj": u(keys[7], (1, n_embd), b_in),
        # FeedForward: Linear(C, 4C) + ReLU + Linear(4C, C), pre-transposed.
        "w_fc1": u(keys[8], (n_embd, 4 * n_embd), b_in),
        "b_fc1": u(keys[9], (1, 4 * n_embd), b_in),
        "w_fc2": u(keys[10], (4 * n_embd, n_embd), b_fc2),
        "b_fc2": u(keys[11], (1, n_embd), b_fc2),
    }

    out = encoder_forward(x, params, num_heads=num_heads, head_size=head_size)
    out = jax.block_until_ready(out)

    ref = reference(x, params, num_heads=num_heads, head_size=head_size)
    assert out.shape == (B, T, n_embd), out.shape
    max_err = float(jnp.max(jnp.abs(out - ref)))
    # Tolerance slightly loosened because the softmax denominator uses the
    # hardware approximate reciprocal (EUP vrcp).
    assert jnp.allclose(out, ref, atol=5e-3, rtol=5e-3), max_err

    print("KERNEL_OK")
</pallas_src>

<mosaic_0001>
module attributes {stable_mosaic.version = 11 : i64} {
  func.func @_encoder_kernel(%arg0: i32, %arg1: memref<1x8x32xf32, #tpu.memory_space<vmem>>, %arg2: memref<1x32xf32, #tpu.memory_space<vmem>>, %arg3: memref<1x32xf32, #tpu.memory_space<vmem>>, %arg4: memref<32x96xf32, #tpu.memory_space<vmem>>, %arg5: memref<32x32xf32, #tpu.memory_space<vmem>>, %arg6: memref<1x32xf32, #tpu.memory_space<vmem>>, %arg7: memref<1x32xf32, #tpu.memory_space<vmem>>, %arg8: memref<1x32xf32, #tpu.memory_space<vmem>>, %arg9: memref<32x128xf32, #tpu.memory_space<vmem>>, %arg10: memref<1x128xf32, #tpu.memory_space<vmem>>, %arg11: memref<128x32xf32, #tpu.memory_space<vmem>>, %arg12: memref<1x32xf32, #tpu.memory_space<vmem>>, %arg13: memref<1x8x32xf32, #tpu.memory_space<vmem>>) attributes {dimension_semantics = [#tpu.dimension_semantics<parallel>], iteration_bounds = array<i64: 2>, scalar_prefetch = 0 : i64, scratch_operands = 0 : i64, tpu.core_type = #tpu.core_type<tc>, window_params = [{transform_indices = @transform_0, window_bounds = array<i64: 1, 8, 32>}, {pipeline_mode = #tpu.pipeline_mode<synchronous>, transform_indices = @transform_1, window_bounds = array<i64: 1, 32>}, {pipeline_mode = #tpu.pipeline_mode<synchronous>, transform_indices = @transform_2, window_bounds = array<i64: 1, 32>}, {pipeline_mode = #tpu.pipeline_mode<synchronous>, transform_indices = @transform_3, window_bounds = array<i64: 32, 96>}, {pipeline_mode = #tpu.pipeline_mode<synchronous>, transform_indices = @transform_4, window_bounds = array<i64: 32, 32>}, {pipeline_mode = #tpu.pipeline_mode<synchronous>, transform_indices = @transform_5, window_bounds = array<i64: 1, 32>}, {pipeline_mode = #tpu.pipeline_mode<synchronous>, transform_indices = @transform_6, window_bounds = array<i64: 1, 32>}, {pipeline_mode = #tpu.pipeline_mode<synchronous>, transform_indices = @transform_7, window_bounds = array<i64: 1, 32>}, {pipeline_mode = #tpu.pipeline_mode<synchronous>, transform_indices = @transform_8, window_bounds = array<i64: 32, 128>}, {pipeline_mode = #tpu.pipeline_mode<synchronous>, transform_indices = @transform_9, window_bounds = array<i64: 1, 128>}, {pipeline_mode = #tpu.pipeline_mode<synchronous>, transform_indices = @transform_10, window_bounds = array<i64: 128, 32>}, {pipeline_mode = #tpu.pipeline_mode<synchronous>, transform_indices = @transform_11, window_bounds = array<i64: 1, 32>}, {transform_indices = @transform_12, window_bounds = array<i64: 1, 8, 32>}]} {
    %c0 = arith.constant 0 : index
    %c0_0 = arith.constant 0 : index
    %c0_1 = arith.constant 0 : index
    %0 = vector.load %arg1[%c0, %c0_0, %c0_1] : memref<1x8x32xf32, #tpu.memory_space<vmem>>, vector<1x8x32xf32>
    %1 = vector.shape_cast %0 : vector<1x8x32xf32> to vector<8x32xf32>
    %c0_2 = arith.constant 0 : index
    %c0_3 = arith.constant 0 : index
    %2 = vector.load %arg2[%c0_2, %c0_3] : memref<1x32xf32, #tpu.memory_space<vmem>>, vector<1x32xf32>
    %c0_4 = arith.constant 0 : index
    %c0_5 = arith.constant 0 : index
    %3 = vector.load %arg3[%c0_4, %c0_5] : memref<1x32xf32, #tpu.memory_space<vmem>>, vector<1x32xf32>
    %cst = arith.constant dense<0.000000e+00> : vector<8xf32>
    %4 = vector.multi_reduction <add>, %1, %cst [1] : vector<8x32xf32> to vector<8xf32>
    %5 = vector.shape_cast %4 : vector<8xf32> to vector<8x1xf32>
    %cst_6 = arith.constant 3.200000e+01 : f32
    %6 = vector.broadcast %cst_6 : f32 to vector<8x1xf32>
    %7 = arith.divf %5, %6 : vector<8x1xf32>
    %8 = vector.broadcast %7 : vector<8x1xf32> to vector<8x32xf32>
    %9 = arith.subf %1, %8 : vector<8x32xf32>
    %10 = arith.mulf %9, %9 : vector<8x32xf32>
    %cst_7 = arith.constant dense<0.000000e+00> : vector<8xf32>
    %11 = vector.multi_reduction <add>, %10, %cst_7 [1] : vector<8x32xf32> to vector<8xf32>
    %12 = vector.shape_cast %11 : vector<8xf32> to vector<8x1xf32>
    %cst_8 = arith.constant 3.200000e+01 : f32
    %13 = vector.broadcast %cst_8 : f32 to vector<8x1xf32>
    %14 = arith.divf %12, %13 : vector<8x1xf32>
    %cst_9 = arith.constant 9.99999974E-6 : f32
    %15 = vector.broadcast %cst_9 : f32 to vector<8x1xf32>
    %16 = arith.addf %14, %15 : vector<8x1xf32>
    %17 = math.rsqrt %16 : vector<8x1xf32>
    %18 = vector.broadcast %17 : vector<8x1xf32> to vector<8x32xf32>
    %19 = arith.mulf %9, %18 : vector<8x32xf32>
    %20 = vector.broadcast %2 : vector<1x32xf32> to vector<8x32xf32>
    %21 = arith.mulf %19, %20 : vector<8x32xf32>
    %22 = vector.broadcast %3 : vector<1x32xf32> to vector<8x32xf32>
    %23 = arith.addf %21, %22 : vector<8x32xf32>
    %c0_10 = arith.constant 0 : index
    %c0_11 = arith.constant 0 : index
    %24 = vector.load %arg4[%c0_10, %c0_11] : memref<32x96xf32, #tpu.memory_space<vmem>>, vector<32x96xf32>
    %cst_12 = arith.constant dense<0.000000e+00> : vector<8x96xf32>
    %25 = tpu.matmul %23, %24, %cst_12 {dimension_numbers = #tpu.dot_dimension_numbers<[1], [0], [0], [1], [0, 0, 1, 1], [], []>} : vector<8x32xf32>, vector<32x96xf32>, vector<8x96xf32> -> vector<8x96xf32>
    %26 = vector.extract_strided_slice %25 {offsets = [0, 0], sizes = [8, 8], strides = [1, 1]} : vector<8x96xf32> to vector<8x8xf32>
    %27 = vector.extract_strided_slice %25 {offsets = [0, 32], sizes = [8, 8], strides = [1, 1]} : vector<8x96xf32> to vector<8x8xf32>
    %28 = vector.extract_strided_slice %25 {offsets = [0, 64], sizes = [8, 8], strides = [1, 1]} : vector<8x96xf32> to vector<8x8xf32>
    %cst_13 = arith.constant dense<0.000000e+00> : vector<8x8xf32>
    %29 = tpu.matmul %26, %27, %cst_13 {dimension_numbers = #tpu.dot_dimension_numbers<[1], [1], [0], [0], [0, 0, 1, 0], [], []>} : vector<8x8xf32>, vector<8x8xf32>, vector<8x8xf32> -> vector<8x8xf32>
    %cst_14 = arith.constant 0.176776692 : f32
    %30 = vector.broadcast %cst_14 : f32 to vector<8x8xf32>
    %31 = arith.mulf %29, %30 : vector<8x8xf32>
    %cst_15 = arith.constant dense<0xFF800000> : vector<8xf32>
    %32 = vector.multi_reduction <maximumf>, %31, %cst_15 [1] : vector<8x8xf32> to vector<8xf32>
    %33 = vector.shape_cast %32 : vector<8xf32> to vector<8x1xf32>
    %34 = vector.broadcast %33 : vector<8x1xf32> to vector<8x8xf32>
    %35 = arith.subf %31, %34 : vector<8x8xf32>
    %36 = math.exp %35 : vector<8x8xf32>
    %cst_16 = arith.constant dense<0.000000e+00> : vector<8xf32>
    %37 = vector.multi_reduction <add>, %36, %cst_16 [1] : vector<8x8xf32> to vector<8xf32>
    %38 = vector.shape_cast %37 : vector<8xf32> to vector<8x1xf32>
    %39 = tpu.reciprocal %38 {approx = true} : vector<8x1xf32> -> vector<8x1xf32>
    %40 = vector.broadcast %39 : vector<8x1xf32> to vector<8x8xf32>
    %41 = arith.mulf %36, %40 : vector<8x8xf32>
    %cst_17 = arith.constant dense<0.000000e+00> : vector<8x8xf32>
    %42 = tpu.matmul %41, %28, %cst_17 {dimension_numbers = #tpu.dot_dimension_numbers<[1], [0], [0], [1], [0, 0, 1, 1], [], []>} : vector<8x8xf32>, vector<8x8xf32>, vector<8x8xf32> -> vector<8x8xf32>
    %43 = vector.extract_strided_slice %25 {offsets = [0, 8], sizes = [8, 8], strides = [1, 1]} : vector<8x96xf32> to vector<8x8xf32>
    %44 = vector.extract_strided_slice %25 {offsets = [0, 40], sizes = [8, 8], strides = [1, 1]} : vector<8x96xf32> to vector<8x8xf32>
    %45 = vector.extract_strided_slice %25 {offsets = [0, 72], sizes = [8, 8], strides = [1, 1]} : vector<8x96xf32> to vector<8x8xf32>
    %cst_18 = arith.constant dense<0.000000e+00> : vector<8x8xf32>
    %46 = tpu.matmul %43, %44, %cst_18 {dimension_numbers = #tpu.dot_dimension_numbers<[1], [1], [0], [0], [0, 0, 1, 0], [], []>} : vector<8x8xf32>, vector<8x8xf32>, vector<8x8xf32> -> vector<8x8xf32>
    %cst_19 = arith.constant 0.176776692 : f32
    %47 = vector.broadcast %cst_19 : f32 to vector<8x8xf32>
    %48 = arith.mulf %46, %47 : vector<8x8xf32>
    %cst_20 = arith.constant dense<0xFF800000> : vector<8xf32>
    %49 = vector.multi_reduction <maximumf>, %48, %cst_20 [1] : vector<8x8xf32> to vector<8xf32>
    %50 = vector.shape_cast %49 : vector<8xf32> to vector<8x1xf32>
    %51 = vector.broadcast %50 : vector<8x1xf32> to vector<8x8xf32>
    %52 = arith.subf %48, %51 : vector<8x8xf32>
    %53 = math.exp %52 : vector<8x8xf32>
    %cst_21 = arith.constant dense<0.000000e+00> : vector<8xf32>
    %54 = vector.multi_reduction <add>, %53, %cst_21 [1] : vector<8x8xf32> to vector<8xf32>
    %55 = vector.shape_cast %54 : vector<8xf32> to vector<8x1xf32>
    %56 = tpu.reciprocal %55 {approx = true} : vector<8x1xf32> -> vector<8x1xf32>
    %57 = vector.broadcast %56 : vector<8x1xf32> to vector<8x8xf32>
    %58 = arith.mulf %53, %57 : vector<8x8xf32>
    %cst_22 = arith.constant dense<0.000000e+00> : vector<8x8xf32>
    %59 = tpu.matmul %58, %45, %cst_22 {dimension_numbers = #tpu.dot_dimension_numbers<[1], [0], [0], [1], [0, 0, 1, 1], [], []>} : vector<8x8xf32>, vector<8x8xf32>, vector<8x8xf32> -> vector<8x8xf32>
    %60 = vector.extract_strided_slice %25 {offsets = [0, 16], sizes = [8, 8], strides = [1, 1]} : vector<8x96xf32> to vector<8x8xf32>
    %61 = vector.extract_strided_slice %25 {offsets = [0, 48], sizes = [8, 8], strides = [1, 1]} : vector<8x96xf32> to vector<8x8xf32>
    %62 = vector.extract_strided_slice %25 {offsets = [0, 80], sizes = [8, 8], strides = [1, 1]} : vector<8x96xf32> to vector<8x8xf32>
    %cst_23 = arith.constant dense<0.000000e+00> : vector<8x8xf32>
    %63 = tpu.matmul %60, %61, %cst_23 {dimension_numbers = #tpu.dot_dimension_numbers<[1], [1], [0], [0], [0, 0, 1, 0], [], []>} : vector<8x8xf32>, vector<8x8xf32>, vector<8x8xf32> -> vector<8x8xf32>
    %cst_24 = arith.constant 0.176776692 : f32
    %64 = vector.broadcast %cst_24 : f32 to vector<8x8xf32>
    %65 = arith.mulf %63, %64 : vector<8x8xf32>
    %cst_25 = arith.constant dense<0xFF800000> : vector<8xf32>
    %66 = vector.multi_reduction <maximumf>, %65, %cst_25 [1] : vector<8x8xf32> to vector<8xf32>
    %67 = vector.shape_cast %66 : vector<8xf32> to vector<8x1xf32>
    %68 = vector.broadcast %67 : vector<8x1xf32> to vector<8x8xf32>
    %69 = arith.subf %65, %68 : vector<8x8xf32>
    %70 = math.exp %69 : vector<8x8xf32>
    %cst_26 = arith.constant dense<0.000000e+00> : vector<8xf32>
    %71 = vector.multi_reduction <add>, %70, %cst_26 [1] : vector<8x8xf32> to vector<8xf32>
    %72 = vector.shape_cast %71 : vector<8xf32> to vector<8x1xf32>
    %73 = tpu.reciprocal %72 {approx = true} : vector<8x1xf32> -> vector<8x1xf32>
    %74 = vector.broadcast %73 : vector<8x1xf32> to vector<8x8xf32>
    %75 = arith.mulf %70, %74 : vector<8x8xf32>
    %cst_27 = arith.constant dense<0.000000e+00> : vector<8x8xf32>
    %76 = tpu.matmul %75, %62, %cst_27 {dimension_numbers = #tpu.dot_dimension_numbers<[1], [0], [0], [1], [0, 0, 1, 1], [], []>} : vector<8x8xf32>, vector<8x8xf32>, vector<8x8xf32> -> vector<8x8xf32>
    %77 = vector.extract_strided_slice %25 {offsets = [0, 24], sizes = [8, 8], strides = [1, 1]} : vector<8x96xf32> to vector<8x8xf32>
    %78 = vector.extract_strided_slice %25 {offsets = [0, 56], sizes = [8, 8], strides = [1, 1]} : vector<8x96xf32> to vector<8x8xf32>
    %79 = vector.extract_strided_slice %25 {offsets = [0, 88], sizes = [8, 8], strides = [1, 1]} : vector<8x96xf32> to vector<8x8xf32>
    %cst_28 = arith.constant dense<0.000000e+00> : vector<8x8xf32>
    %80 = tpu.matmul %77, %78, %cst_28 {dimension_numbers = #tpu.dot_dimension_numbers<[1], [1], [0], [0], [0, 0, 1, 0], [], []>} : vector<8x8xf32>, vector<8x8xf32>, vector<8x8xf32> -> vector<8x8xf32>
    %cst_29 = arith.constant 0.176776692 : f32
    %81 = vector.broadcast %cst_29 : f32 to vector<8x8xf32>
    %82 = arith.mulf %80, %81 : vector<8x8xf32>
    %cst_30 = arith.constant dense<0xFF800000> : vector<8xf32>
    %83 = vector.multi_reduction <maximumf>, %82, %cst_30 [1] : vector<8x8xf32> to vector<8xf32>
    %84 = vector.shape_cast %83 : vector<8xf32> to vector<8x1xf32>
    %85 = vector.broadcast %84 : vector<8x1xf32> to vector<8x8xf32>
    %86 = arith.subf %82, %85 : vector<8x8xf32>
    %87 = math.exp %86 : vector<8x8xf32>
    %cst_31 = arith.constant dense<0.000000e+00> : vector<8xf32>
    %88 = vector.multi_reduction <add>, %87, %cst_31 [1] : vector<8x8xf32> to vector<8xf32>
    %89 = vector.shape_cast %88 : vector<8xf32> to vector<8x1xf32>
    %90 = tpu.reciprocal %89 {approx = true} : vector<8x1xf32> -> vector<8x1xf32>
    %91 = vector.broadcast %90 : vector<8x1xf32> to vector<8x8xf32>
    %92 = arith.mulf %87, %91 : vector<8x8xf32>
    %cst_32 = arith.constant dense<0.000000e+00> : vector<8x8xf32>
    %93 = tpu.matmul %92, %79, %cst_32 {dimension_numbers = #tpu.dot_dimension_numbers<[1], [0], [0], [1], [0, 0, 1, 1], [], []>} : vector<8x8xf32>, vector<8x8xf32>, vector<8x8xf32> -> vector<8x8xf32>
    %94 = tpu.concatenate %42, %59, %76, %93 in 1 : vector<8x8xf32>, vector<8x8xf32>, vector<8x8xf32>, vector<8x8xf32> -> vector<8x32xf32>
    %c0_33 = arith.constant 0 : index
    %c0_34 = arith.constant 0 : index
    %95 = vector.load %arg5[%c0_33, %c0_34] : memref<32x32xf32, #tpu.memory_space<vmem>>, vector<32x32xf32>
    %cst_35 = arith.constant dense<0.000000e+00> : vector<8x32xf32>
    %96 = tpu.matmul %94, %95, %cst_35 {dimension_numbers = #tpu.dot_dimension_numbers<[1], [0], [0], [1], [0, 0, 1, 1], [], []>} : vector<8x32xf32>, vector<32x32xf32>, vector<8x32xf32> -> vector<8x32xf32>
    %c0_36 = arith.constant 0 : index
    %c0_37 = arith.constant 0 : index
    %97 = vector.load %arg6[%c0_36, %c0_37] : memref<1x32xf32, #tpu.memory_space<vmem>>, vector<1x32xf32>
    %98 = vector.broadcast %97 : vector<1x32xf32> to vector<8x32xf32>
    %99 = arith.addf %96, %98 : vector<8x32xf32>
    %100 = arith.addf %1, %99 : vector<8x32xf32>
    %c0_38 = arith.constant 0 : index
    %c0_39 = arith.constant 0 : index
    %101 = vector.load %arg7[%c0_38, %c0_39] : memref<1x32xf32, #tpu.memory_space<vmem>>, vector<1x32xf32>
    %c0_40 = arith.constant 0 : index
    %c0_41 = arith.constant 0 : index
    %102 = vector.load %arg8[%c0_40, %c0_41] : memref<1x32xf32, #tpu.memory_space<vmem>>, vector<1x32xf32>
    %cst_42 = arith.constant dense<0.000000e+00> : vector<8xf32>
    %103 = vector.multi_reduction <add>, %100, %cst_42 [1] : vector<8x32xf32> to vector<8xf32>
    %104 = vector.shape_cast %103 : vector<8xf32> to vector<8x1xf32>
    %cst_43 = arith.constant 3.200000e+01 : f32
    %105 = vector.broadcast %cst_43 : f32 to vector<8x1xf32>
    %106 = arith.divf %104, %105 : vector<8x1xf32>
    %107 = vector.broadcast %106 : vector<8x1xf32> to vector<8x32xf32>
    %108 = arith.subf %100, %107 : vector<8x32xf32>
    %109 = arith.mulf %108, %108 : vector<8x32xf32>
    %cst_44 = arith.constant dense<0.000000e+00> : vector<8xf32>
    %110 = vector.multi_reduction <add>, %109, %cst_44 [1] : vector<8x32xf32> to vector<8xf32>
    %111 = vector.shape_cast %110 : vector<8xf32> to vector<8x1xf32>
    %cst_45 = arith.constant 3.200000e+01 : f32
    %112 = vector.broadcast %cst_45 : f32 to vector<8x1xf32>
    %113 = arith.divf %111, %112 : vector<8x1xf32>
    %cst_46 = arith.constant 9.99999974E-6 : f32
    %114 = vector.broadcast %cst_46 : f32 to vector<8x1xf32>
    %115 = arith.addf %113, %114 : vector<8x1xf32>
    %116 = math.rsqrt %115 : vector<8x1xf32>
    %117 = vector.broadcast %116 : vector<8x1xf32> to vector<8x32xf32>
    %118 = arith.mulf %108, %117 : vector<8x32xf32>
    %119 = vector.broadcast %101 : vector<1x32xf32> to vector<8x32xf32>
    %120 = arith.mulf %118, %119 : vector<8x32xf32>
    %121 = vector.broadcast %102 : vector<1x32xf32> to vector<8x32xf32>
    %122 = arith.addf %120, %121 : vector<8x32xf32>
    %c0_47 = arith.constant 0 : index
    %c0_48 = arith.constant 0 : index
    %123 = vector.load %arg9[%c0_47, %c0_48] : memref<32x128xf32, #tpu.memory_space<vmem>>, vector<32x128xf32>
    %cst_49 = arith.constant dense<0.000000e+00> : vector<8x128xf32>
    %124 = tpu.matmul %122, %123, %cst_49 {dimension_numbers = #tpu.dot_dimension_numbers<[1], [0], [0], [1], [0, 0, 1, 1], [], []>} : vector<8x32xf32>, vector<32x128xf32>, vector<8x128xf32> -> vector<8x128xf32>
    %c0_50 = arith.constant 0 : index
    %c0_51 = arith.constant 0 : index
    %125 = vector.load %arg10[%c0_50, %c0_51] : memref<1x128xf32, #tpu.memory_space<vmem>>, vector<1x128xf32>
    %126 = vector.broadcast %125 : vector<1x128xf32> to vector<8x128xf32>
    %127 = arith.addf %124, %126 : vector<8x128xf32>
    %cst_52 = arith.constant 0.000000e+00 : f32
    %128 = vector.broadcast %cst_52 : f32 to vector<8x128xf32>
    %129 = arith.maximumf %127, %128 : vector<8x128xf32>
    %c0_53 = arith.constant 0 : index
    %c0_54 = arith.constant 0 : index
    %130 = vector.load %arg11[%c0_53, %c0_54] : memref<128x32xf32, #tpu.memory_space<vmem>>, vector<128x32xf32>
    %cst_55 = arith.constant dense<0.000000e+00> : vector<8x32xf32>
    %131 = tpu.matmul %129, %130, %cst_55 {dimension_numbers = #tpu.dot_dimension_numbers<[1], [0], [0], [1], [0, 0, 1, 1], [], []>} : vector<8x128xf32>, vector<128x32xf32>, vector<8x32xf32> -> vector<8x32xf32>
    %c0_56 = arith.constant 0 : index
    %c0_57 = arith.constant 0 : index
    %132 = vector.load %arg12[%c0_56, %c0_57] : memref<1x32xf32, #tpu.memory_space<vmem>>, vector<1x32xf32>
    %133 = vector.broadcast %132 : vector<1x32xf32> to vector<8x32xf32>
    %134 = arith.addf %131, %133 : vector<8x32xf32>
    %135 = arith.addf %100, %134 : vector<8x32xf32>
    %136 = vector.shape_cast %135 : vector<8x32xf32> to vector<1x8x32xf32>
    %c0_58 = arith.constant 0 : index
    %c0_59 = arith.constant 0 : index
    %c0_60 = arith.constant 0 : index
    %137 = vector.load %arg13[%c0_58, %c0_59, %c0_60] : memref<1x8x32xf32, #tpu.memory_space<vmem>>, vector<1x8x32xf32>
    tpu.vector_store %arg13[%c0_58, %c0_59, %c0_60], %136 {strides = array<i32>} : memref<1x8x32xf32, #tpu.memory_space<vmem>>, vector<1x8x32xf32>,
    return
  }
  func.func @transform_0(%arg0: i32) -> (i32, i32, i32) {
    %c0_i32 = arith.constant 0 : i32
    %c0_i32_0 = arith.constant 0 : i32
    %c0_i32_1 = arith.constant 0 : i32
    return %arg0, %c0_i32, %c0_i32_0 : i32, i32, i32
  }
  func.func @transform_1(%arg0: i32) -> (i32, i32) {
    %c0_i32 = arith.constant 0 : i32
    %c0_i32_0 = arith.constant 0 : i32
    %c0_i32_1 = arith.constant 0 : i32
    return %c0_i32, %c0_i32_0 : i32, i32
  }
  func.func @transform_2(%arg0: i32) -> (i32, i32) {
    %c0_i32 = arith.constant 0 : i32
    %c0_i32_0 = arith.constant 0 : i32
    %c0_i32_1 = arith.constant 0 : i32
    return %c0_i32, %c0_i32_0 : i32, i32
  }
  func.func @transform_3(%arg0: i32) -> (i32, i32) {
    %c0_i32 = arith.constant 0 : i32
    %c0_i32_0 = arith.constant 0 : i32
    %c0_i32_1 = arith.constant 0 : i32
    return %c0_i32, %c0_i32_0 : i32, i32
  }
  func.func @transform_4(%arg0: i32) -> (i32, i32) {
    %c0_i32 = arith.constant 0 : i32
    %c0_i32_0 = arith.constant 0 : i32
    %c0_i32_1 = arith.constant 0 : i32
    return %c0_i32, %c0_i32_0 : i32, i32
  }
  func.func @transform_5(%arg0: i32) -> (i32, i32) {
    %c0_i32 = arith.constant 0 : i32
    %c0_i32_0 = arith.constant 0 : i32
    %c0_i32_1 = arith.constant 0 : i32
    return %c0_i32, %c0_i32_0 : i32, i32
  }
  func.func @transform_6(%arg0: i32) -> (i32, i32) {
    %c0_i32 = arith.constant 0 : i32
    %c0_i32_0 = arith.constant 0 : i32
    %c0_i32_1 = arith.constant 0 : i32
    return %c0_i32, %c0_i32_0 : i32, i32
  }
  func.func @transform_7(%arg0: i32) -> (i32, i32) {
    %c0_i32 = arith.constant 0 : i32
    %c0_i32_0 = arith.constant 0 : i32
    %c0_i32_1 = arith.constant 0 : i32
    return %c0_i32, %c0_i32_0 : i32, i32
  }
  func.func @transform_8(%arg0: i32) -> (i32, i32) {
    %c0_i32 = arith.constant 0 : i32
    %c0_i32_0 = arith.constant 0 : i32
    %c0_i32_1 = arith.constant 0 : i32
    return %c0_i32, %c0_i32_0 : i32, i32
  }
  func.func @transform_9(%arg0: i32) -> (i32, i32) {
    %c0_i32 = arith.constant 0 : i32
    %c0_i32_0 = arith.constant 0 : i32
    %c0_i32_1 = arith.constant 0 : i32
    return %c0_i32, %c0_i32_0 : i32, i32
  }
  func.func @transform_10(%arg0: i32) -> (i32, i32) {
    %c0_i32 = arith.constant 0 : i32
    %c0_i32_0 = arith.constant 0 : i32
    %c0_i32_1 = arith.constant 0 : i32
    return %c0_i32, %c0_i32_0 : i32, i32
  }
  func.func @transform_11(%arg0: i32) -> (i32, i32) {
    %c0_i32 = arith.constant 0 : i32
    %c0_i32_0 = arith.constant 0 : i32
    %c0_i32_1 = arith.constant 0 : i32
    return %c0_i32, %c0_i32_0 : i32, i32
  }
  func.func @transform_12(%arg0: i32) -> (i32, i32, i32) {
    %c0_i32 = arith.constant 0 : i32
    %c0_i32_0 = arith.constant 0 : i32
    %c0_i32_1 = arith.constant 0 : i32
    return %arg0, %c0_i32, %c0_i32_0 : i32, i32, i32
  }
}

</mosaic_0001>

<bundles_post_ra>
// kernel: tpu_custom_call.1
= control target key start
LH: loop header
LB: loop body
LE: loop exit
PB: predicated region body
PF: predicated region fallthrough
CT: control target
= control target key end

     0   :  { %s2323_s0 = inlined_call_operand.vmem [shape: f32[2,8,32], index: 0, kind: input, shape index: {}]   ;;  %s2324_s1 = inlined_call_operand.vmem [shape: f32[1,32], index: 1, kind: input, shape index: {}]   ;;  %s2325_s2 = inlined_call_operand.vmem [shape: f32[1,32], index: 2, kind: input, shape index: {}]   ;;  %s2326_s3 = inlined_call_operand.vmem [shape: f32[32,96], index: 3, kind: input, shape index: {}]   ;;  %s2327_s4 = inlined_call_operand.vmem [shape: f32[32,32], index: 4, kind: input, shape index: {}]   ;;  %s2328_s5 = inlined_call_operand.vmem [shape: f32[1,32], index: 5, kind: input, shape index: {}]   ;;  %s2329_s6 = inlined_call_operand.vmem [shape: f32[1,32], index: 6, kind: input, shape index: {}]   ;;  %s2330_s7 = inlined_call_operand.vmem [shape: f32[1,32], index: 7, kind: input, shape index: {}]   ;;  %s2331_s8 = inlined_call_operand.vmem [shape: f32[32,128], index: 8, kind: input, shape index: {}]   ;;  %s2332_s9 = inlined_call_operand.vmem [shape: f32[1,128], index: 9, kind: input, shape index: {}]   ;;  %s2333_s10 = inlined_call_operand.vmem [shape: f32[128,32], index: 10, kind: input, shape index: {}]   ;;  %s2334_s11 = inlined_call_operand.vmem [shape: f32[1,32], index: 11, kind: input, shape index: {}]   ;;  %s2335_s12 = inlined_call_operand.hbm [shape: f32[2,8,32], index: 12, kind: output, shape index: {}]  }
   0x1   :  { %2336 = sst [smem:[#allocation5_spill]] %s2323_s0 }
   0x2   :  { %2337 = sst [smem:[#allocation6_spill]] %s2324_s1 }
   0x3   :  { %17 = vsyncpa [#allocation3], 0 }
   0x4   :  { %19 = vsyncpa [#allocation3 + $0x1], 0  ;;  %s2019_s21 = smov 0   ;;  %s2021_s22 = smov 0  }
   0x5   :  { %s2023_s23 = smov 0   ;;  %s2025_s24 = smov 0  }
   0x6 LB: > { %s2040_s25 = sadd.s32 4294967295, %s1934_s24   ;;  %s1566_s26 = sadd.s32 4294967294, %s1934_s24   ;;  %s1934_s24 = sphi %s2025_s24, %s2345_s24   ;;  %s1930_s23 = sphi %s2023_s23, %s2344_s23   ;;  %s1926_s22 = sphi %s2021_s22, %s2343_s22   ;;  %s1922_s21 = sphi %s2019_s21, %s2342_s21  }
   0x7   : > { %s2044_s27 = sadd.s32 1, %s1934_s24   ;;  %s289_s28 = sadd.s32 1, %s1930_s23 }
   0x8   : > { %s286_s29 = ssub.s32 %s1934_s24, %s2044_s27  ;;  %p299_p0 = scmp.ne.s32.totalorder %s1930_s23, %s1926_s22 }
   0x9   : > { %p287_p1 = scmp.eq.s32.totalorder %s286_s29, 0  ;;  %p300_p2 = scmp.eq.s32.totalorder %s2040_s25, 1 }
   0xa   : > { %p305_p3 = scmp.ne.s32.totalorder %s1926_s22, %s1922_s21  ;;  %p306_p4 = scmp.eq.s32.totalorder %s1566_s26, 1 }
   0xb   : > { %s2055_s30 = scalar_select %p287_p1, %s1930_s23, %s289_s28  }
   0xc   : > { %p2057_p5 = por %p300_p2, %p299_p0  ;;  %p2061_p6 = por %p306_p4, %p305_p3 }
   0xd   : > { %p1569_p7 = scmp.ge.s32.totalorder %s1934_s24, 1  ;;  %p364_p8 = scmp.lt.s32.totalorder %s1934_s24, 3 }
   0xf   : > { %p365_p9 = pnand %p1569_p7, %p364_p8 }
  0x10   : > { %p405_p10 = scmp.lt.s32.totalorder (!%p365_p9), %s2040_s25, 1  ;;  %vm412_vm0 = vcmask (!%p365_p9), 261120   ;;  %s2340_s0 = sld [smem:[#allocation5_spill]] (!%p365_p9)  ;;  %v441_v7 = vld [vmem:[%s2326_s3] sm:$0xff] (!%p365_p9)  ;;  %v442_v8 = vld [vmem:[%s2326_s3 + $0x8] sm:$0xff] (!%p365_p9)  ;;  %v443_v9 = vld [vmem:[%s2326_s3 + $0x10] sm:$0xff] (!%p365_p9) }
  0x11   : > { %368 = sbr.rel (%p365_p9) target bundleno = 2520 (0x9d8), region = 68  ;;  %v1936_v10 = vmov (!%p365_p9), 0.0|0.0   ;;  %v1755_v11 = vpack.c.bf16 (!%p365_p9), %v442_v8, %v441_v7  ;;  %v444_v12 = vld [vmem:[%s2326_s3 + $0x18] sm:$0xff] (!%p365_p9)  ;;  %vm1937_vm1 = vmmov (!%p365_p9), 0   ;;  %v1938_v13 = vmov (!%p365_p9), 0.0   ;;  %s2341_s1 = sld [smem:[#allocation6_spill]] (!%p365_p9) }
  0x12   : > { %1754 = vmatprep.subr.bf16.mxu1 (!%p365_p9), %v1936_v10  ;;  %1654 = vmatprep.mubr.msk.f32.mxu1 (!%p365_p9), %vm1937_vm1, %v1938_v13  ;;  %v1758_v14 = vpack.c.bf16 (!%p365_p9), %v444_v12, %v443_v9  ;;  %v1573_v21 = vld [vmem:[%s2325_s2] ss:$0 sm:$0xff] (!%p365_p9)  ;;  %s1939_s29 = smov (!%p365_p9), 120   ;;  %s1942_s17 = smov (!%p365_p9), 80   ;;  %vm521_vm2 = vcmask (!%p365_p9), 64512   ;;  %vm1195_vm3 = vcmask (!%p365_p9), 130048  }
  0x13   : > { %1667 = vmatprep.subr.mxu0 (!%p365_p9), %v1938_v13  ;;  %1669 = vmatprep.mubr.msk.f32.mxu0 (!%p365_p9), %vm1937_vm1, %v1938_v13  ;;  %s1943_s18 = smov (!%p365_p9), 112   ;;  %s1945_s20 = smov (!%p365_p9), 104   ;;  %vm1197_vm4 = vcmask (!%p365_p9), 195584  }
  0x14   : > { %1756 = vmatpush3.bf16.msra.mxu1 (!%p365_p9), %v1755_v11  ;;  %s1946_s26 = smov (!%p365_p9), 64   ;;  %s1947_s28 = smov (!%p365_p9), 48  }
  0x15   : > { %1757 = vmatprep.subr.bf16.mxu1 (!%p365_p9), %v1936_v10 }
  0x17   : > { %v1572_v19 = vld [vmem:[%s2341_s1] ss:$0 sm:$0xff] (!%p365_p9) }
  0x18   : > { %s406_s15 = scalar_select %p405_p10, %s2040_s25, 1  ;;  %1759 = vmatpush3.bf16.msra.mxu1 %v1758_v14 }
  0x19   : > { %1657 = vmatprep.subr.mxu1 %v1938_v13 }
  0x1a   : > { %s1571_s16 = sshll.u32 %s406_s15, 3  ;;  %s1940_s15 = smov 96  }
  0x1b   : > { %s408_s19 = scalar_lea.vmem %s2340_s0, %s1571_s16  ;;  %s1941_s16 = smov 88  }
  0x1c   : > { %v2072_v0 = vld [vmem:[%s408_s19] sm:$0xff]  ;;  %s1944_s19 = smov 72   ;;  %s1595_s0 = sshll.u32 %s2040_s25, 7 }
  0x1d   : > { %v413_v1 = vsel %vm412_vm0, %v2072_v0, 0.0 }
  0x1e   : > { %414 = vadd.xlane.f32.xlu0 %v413_v1 }
  0xab   : > { %v415_v2 = vpop.xlane.xlu0 %414 }
  0xac   : > { %v417_v3 = vmul.f32 0.03125, %v415_v2 }
  0xae   : > { %v418_v4 = vsub.f32 %v2072_v0, %v417_v3 }
  0xb0   : > { %v419_v5 = vmul.f32 %v418_v4, %v418_v4 }
  0xb2   : > { %v420_v6 = vsel %vm412_vm0, %v419_v5, 0.0 }
  0xb3   : > { %421 = vadd.xlane.f32.xlu0 %v420_v6 }
 0x140   : > { %v422_v15 = vpop.xlane.xlu0 %421 }
 0x141   : > { %v423_v16 = vmul.f32 0.03125, %v422_v15 }
 0x143   : > { %v424_v17 = vadd.f32 1e-05, %v423_v16 }
 0x145   : > { %1852 = vrsqrt.f32 %v424_v17 }
 0x14f   : > { %v1853_v18 = vpop.eup %1852 }
 0x150   : > { %v426_v20 = vmul.f32 %v1853_v18, %v418_v4 }
 0x152   : > { %v433_v22 = vmul.f32 %v1572_v19, %v426_v20 }
 0x154   : > { %v440_v23 = vadd.f32 %v1573_v21, %v433_v22 }
 0x156   : > { %1655 = vmatmul.mubr.msk.f32.vlgmr.msra.gmra.mrb[0].mxu1 %vm412_vm0, %v440_v23 }
 0x157   : > { %1659 = vmatprep.mubr.msk.f32.mxu1 %vm1937_vm1, %v1938_v13 }
 0x229   : > { %v2107_v24 = vpop.f32.mrb[0].mxu1 }
 0x22a   : > { %684 = vrot.lane.b32.xlu0 %v2107_v24, %s1939_s29  ;;  %519 = vrot.lane.b32.xlu1 %v2107_v24, %s1940_s15  ;;  %v1656_v25 = vpop.f32.mrb[1].mxu1  ;;  %s1948_s29 = smov 40   ;;  %s1949_s15 = smov 56  }
 0x22b   : > { %v1200_v25 = vld [vmem:[%s2327_s4 + $0x8] sm:$0xff] }
 0x22e   : > { %686 = vrot.lane.b32.xlu1 %v2107_v24, %s1941_s16  ;;  %s1951_s16 = smov 16  }
 0x232   : > { %852 = vrot.lane.b32.xlu1 %v2107_v24, %s1942_s17  ;;  %s1952_s17 = smov 24  }
 0x236   : > { %850 = vrot.lane.b32.xlu1 %v2107_v24, %s1943_s18 }
 0x23a   : > { %1018 = vrot.lane.b32.xlu1 %v2107_v24, %s1944_s19 }
 0x23e   : > { %1016 = vrot.lane.b32.xlu1 %v2107_v24, %s1945_s20 }
 0x29c   : > { %v520_v26 = vpop.permute.xlu1 %519  ;;  %v685_v28 = vpop.permute.xlu0 %684 }
 0x29d   : > { %1658 = vmatpush3.xpose.msk.msra.mxu1 %vm521_vm2, %v520_v26 }
 0x29e   : > { %1662 = vmatprep.subr.mxu1 %v1938_v13 }
 0x2a0   : > { %1660 = vmatmul.mubr.msk.f32.vlgmr.msra.gmra.mrb[2].mxu1 %vm521_vm2, %v2107_v24  ;;  %v687_v27 = vpop.permute.xlu1 %686 }
 0x2a1   : > { %1668 = vmatpush3.xpose.msk.msra.mxu0 %vm521_vm2, %v687_v27  ;;  %1664 = vmatprep.mubr.msk.f32.mxu1 %vm1937_vm1, %v1938_v13 }
 0x2a2   : > { %1677 = vmatprep.subr.mxu0 %v1938_v13 }
 0x2a4   : > { %1670 = vmatmul.mubr.msk.f32.vlgmr.msra.gmra.mrb[0].mxu0 %vm521_vm2, %v685_v28  ;;  %v853_v29 = vpop.permute.xlu1 %852 }
 0x2a5   : > { %1678 = vmatpush3.xpose.msk.msra.mxu0 %vm521_vm2, %v853_v29  ;;  %1679 = vmatprep.mubr.msk.f32.mxu0 %vm1937_vm1, %v1938_v13  ;;  %v1201_v29 = vld [vmem:[%s2327_s4 + $0x10] sm:$0xff] }
 0x2a6   : > { %1687 = vmatprep.subr.mxu0 %v1938_v13 }
 0x2a8   : > { %v851_v30 = vpop.permute.xlu1 %850 }
 0x2a9   : > { %1680 = vmatmul.mubr.msk.f32.vlgmr.msra.gmra.mrb[2].mxu0 %vm521_vm2, %v851_v30  ;;  %v1202_v30 = vld [vmem:[%s2327_s4 + $0x18] sm:$0xff] }
 0x2aa   : > { %1689 = vmatprep.mubr.msk.f32.mxu0 %vm1937_vm1, %v1938_v13 }
 0x2ac   : > { %v1019_v31 = vpop.permute.xlu1 %1018 }
 0x2ad   : > { %1688 = vmatpush3.xpose.msk.msra.mxu0 %vm521_vm2, %v1019_v31  ;;  %v1764_v31 = vpack.c.bf16 %v1202_v30, %v1201_v29  ;;  %v1591_v30 = vld [vmem:[%s2332_s9] ss:$0 sm:$0xff] }
 0x2ae   : > { %1772 = vmatprep.subr.bf16.mxu0 %v1936_v10 }
 0x2b0   : > { %v1017_v32 = vpop.permute.xlu1 %1016 }
 0x2b1   : > { %1690 = vmatmul.mubr.msk.f32.vlgmr.msra.gmra.mrb[4].mxu0 %vm521_vm2, %v1017_v32 }
 0x2b2   : > { %1751 = vmatprep.mubr.msk.f32.mxu0 %vm1937_vm1, %v1938_v13 }
 0x373   : > { %v592_v33 = vpop.f32.mrb[2].mxu1 }
 0x374   : > { %v596_v34 = vmul.f32 0.17677669, %v592_v33  ;;  %v1661_v35 = vpop.f32.mrb[3].mxu1 }
 0x376   : > { %v597_v36 = vsel %vm521_vm2, %v596_v34, -inf }
 0x377   : > { %v758_v37 = vpop.f32.mrb[0].mxu0  ;;  %598 = vmax.xlane.f32.xlu1 %v597_v36 }
 0x378   : > { %v762_v38 = vmul.f32 0.17677669, %v758_v37  ;;  %v1671_v39 = vpop.f32.mrb[1].mxu0 }
 0x37a   : > { %v763_v40 = vsel %vm521_vm2, %v762_v38, -inf }
 0x37b   : > { %764 = vmax.xlane.f32.xlu0 %v763_v40 }
 0x37c   : > { %v924_v41 = vpop.f32.mrb[2].mxu0 }
 0x37d   : > { %v928_v42 = vmul.f32 0.17677669, %v924_v41  ;;  %v1681_v43 = vpop.f32.mrb[3].mxu0 }
 0x37f   : > { %v929_v44 = vsel %vm521_vm2, %v928_v42, -inf }
 0x380   : > { %930 = vmax.xlane.f32.xlu1 %v929_v44  ;;  %v1587_v44 = vld [vmem:[%s2328_s5] ss:$0 sm:$0xff] }
 0x384   : > { %v1090_v45 = vpop.f32.mrb[4].mxu0 }
 0x385   : > { %v1094_v46 = vmul.f32 0.17677669, %v1090_v45  ;;  %v1691_v47 = vpop.f32.mrb[5].mxu0 }
 0x387   : > { %v1095_v48 = vsel %vm521_vm2, %v1094_v46, -inf }
 0x388   : > { %1096 = vmax.xlane.f32.xlu0 %v1095_v48 }
 0x391   : > { %608 = vrot.lane.b32.xlu1 %v2107_v24, %s1946_s26 }
 0x404   : > { %v599_v49 = vpop.xlane.xlu1 %598 }
 0x405   : > { %v600_v50 = vsub.f32 %v596_v34, %v599_v49 }
 0x407   : > { %v601_v51 = vmul.f32 1.442695, %v600_v50 }
 0x408   : > { %v765_v52 = vpop.xlane.xlu0 %764 }
 0x409   : > { %1854 = vpow2.f32 %v601_v51  ;;  %v766_v53 = vsub.f32 %v762_v38, %v765_v52 }
 0x40b   : > { %v767_v54 = vmul.f32 1.442695, %v766_v53 }
 0x40d   : > { %1856 = vpow2.f32 %v767_v54  ;;  %v931_v55 = vpop.xlane.xlu1 %930  ;;  %v1313_v54 = vld [vmem:[%s2331_s8] sm:$0xff] }
 0x40e   : > { %v932_v56 = vsub.f32 %v928_v42, %v931_v55 }
 0x410   : > { %v933_v57 = vmul.f32 1.442695, %v932_v56  ;;  %v1315_v56 = vld [vmem:[%s2331_s8 + $0x10] sm:$0xff] }
 0x411   : > { %v609_v58 = vpop.permute.xlu1 %608 }
 0x412   : > { %1858 = vpow2.f32 %v933_v57  ;;  %1663 = vmatpush3.msra.mxu1 %v609_v58  ;;  %v1316_v57 = vld [vmem:[%s2331_s8 + $0x18] sm:$0xff] }
 0x413   : > { %v1855_v59 = vpop.eup %1854  ;;  %1672 = vmatprep.subr.mxu1 %v1938_v13  ;;  %v1770_v58 = vpack.c.bf16 %v1316_v57, %v1315_v56 }
 0x414   : > { %v603_v60 = vsel %vm521_vm2, %v1855_v59, 0.0 }
 0x415   : > { %v1097_v61 = vpop.xlane.xlu0 %1096  ;;  %604 = vadd.xlane.f32.xlu1 %v603_v60  ;;  %v1399_v60 = vld [vmem:[%s2333_s10 + $0x8] sm:$0xff] }
 0x416   : > { %v1098_v62 = vsub.f32 %v1094_v46, %v1097_v61  ;;  %v1400_v61 = vld [vmem:[%s2333_s10 + $0x10] sm:$0xff] }
 0x417   : > { %v1857_v63 = vpop.eup %1856 }
 0x418   : > { %v1099_v1 = vmul.f32 1.442695, %v1098_v62  ;;  %v769_v2 = vsel %vm521_vm2, %v1857_v63, 0.0 }
 0x419   : > { %770 = vadd.xlane.f32.xlu0 %v769_v2  ;;  %v1402_v2 = vld [vmem:[%s2333_s10 + $0x20] sm:$0xff] }
 0x41a   : > { %1860 = vpow2.f32 %v1099_v1 }
 0x41c   : > { %v1859_v3 = vpop.eup %1858 }
 0x41d   : > { %v935_v4 = vsel %vm521_vm2, %v1859_v3, 0.0 }
 0x41e   : > { %936 = vadd.xlane.f32.xlu1 %v935_v4 }
 0x424   : > { %v1861_v5 = vpop.eup %1860 }
 0x425   : > { %v1101_v6 = vsel %vm521_vm2, %v1861_v5, 0.0 }
 0x426   : > { %1102 = vadd.xlane.f32.xlu0 %v1101_v6  ;;  %v1405_v6 = vld [vmem:[%s2333_s10 + $0x38] sm:$0xff] }
 0x42f   : > { %940 = vrot.lane.b32.xlu1 %v2107_v24, %s1947_s28 }
 0x433   : > { %1106 = vrot.lane.b32.xlu1 %v2107_v24, %s1948_s29 }
 0x43c   : > { %774 = vrot.lane.b32.xlu0 %v2107_v24, %s1949_s15  ;;  %v1199_v24 = vld [vmem:[%s2327_s4] sm:$0xff]  ;;  %s1950_s15 = smov 8  }
 0x43d   : > { %v1761_v26 = vpack.c.bf16 %v1200_v25, %v1199_v24  ;;  %v1590_v25 = vld [vmem:[%s2330_s7] ss:$0 sm:$0xff] }
 0x4a2   : > { %v605_v7 = vpop.xlane.xlu1 %604 }
 0x4a3   : > { %1862 = vrcp.f32 %v605_v7 }
 0x4a6   : > { %v771_v8 = vpop.xlane.xlu0 %770 }
 0x4a7   : > { %1864 = vrcp.f32 %v771_v8  ;;  %v1406_v8 = vld [vmem:[%s2333_s10 + $0x40] sm:$0xff] }
 0x4ab   : > { %v937_v9 = vpop.xlane.xlu1 %936 }
 0x4ac   : > { %1866 = vrcp.f32 %v937_v9  ;;  %v1407_v9 = vld [vmem:[%s2333_s10 + $0x48] sm:$0xff] }
 0x4ad   : > { %v1863_v11 = vpop.eup %1862 }
 0x4ae   : > { %v607_v12 = vmul.f32 %v1863_v11, %v1855_v59  ;;  %v1398_v59 = vld [vmem:[%s2333_s10] sm:$0xff]  ;;  %v1785_v11 = vpack.c.bf16 %v1407_v9, %v1406_v8 }
 0x4af   : > { %v941_v17 = vpop.permute.xlu1 %940  ;;  %v1773_v62 = vpack.c.bf16 %v1399_v60, %v1398_v59 }
 0x4b0   : > { %1665 = vmatmul.mubr.msk.f32.vlgmr.msra.gmra.mrb[4].mxu1 %vm521_vm2, %v607_v12  ;;  %v1408_v12 = vld [vmem:[%s2333_s10 + $0x50] sm:$0xff] }
 0x4b1   : > { %1674 = vmatprep.mubr.msk.f32.mxu1 %vm1937_vm1, %v1938_v13  ;;  %v1865_v15 = vpop.eup %1864  ;;  %1774 = vmatpush3.bf16.msra.mxu0 %v1773_v62 }
 0x4b2   : > { %v773_v16 = vmul.f32 %v1865_v15, %v1857_v63  ;;  %v1401_v63 = vld [vmem:[%s2333_s10 + $0x18] sm:$0xff]  ;;  %1775 = vmatprep.subr.bf16.mxu0 %v1936_v10 }
 0x4b3   : > { %v1103_v14 = vpop.xlane.xlu0 %1102  ;;  %v1107_v21 = vpop.permute.xlu1 %1106  ;;  %v1776_v1 = vpack.c.bf16 %v1401_v63, %v1400_v61 }
 0x4b4   : > { %1868 = vrcp.f32 %v1103_v14  ;;  %v1409_v14 = vld [vmem:[%s2333_s10 + $0x58] sm:$0xff] }
 0x4b5   : > { %1777 = vmatpush3.bf16.msra.mxu0 %v1776_v1  ;;  %v1788_v15 = vpack.c.bf16 %v1409_v14, %v1408_v12 }
 0x4b6   : > { %v1867_v19 = vpop.eup %1866  ;;  %1778 = vmatprep.subr.bf16.mxu0 %v1936_v10 }
 0x4b7   : > { %v775_v18 = vpop.permute.xlu0 %774  ;;  %v939_v20 = vmul.f32 %v1867_v19, %v1859_v3  ;;  %v1403_v3 = vld [vmem:[%s2333_s10 + $0x28] sm:$0xff] }
 0x4b8   : > { %1673 = vmatpush3.msra.mxu1 %v775_v18  ;;  %v1779_v4 = vpack.c.bf16 %v1403_v3, %v1402_v2 }
 0x4b9   : > { %1675 = vmatmul.mubr.msk.f32.vlgmr.msra.gmra.mrb[6].mxu1 %vm521_vm2, %v773_v16  ;;  %1682 = vmatprep.subr.mxu1 %v1938_v13  ;;  %v1410_v16 = vld [vmem:[%s2333_s10 + $0x60] sm:$0xff] }
 0x4ba   : > { %1683 = vmatpush3.msra.mxu1 %v941_v17  ;;  %1684 = vmatprep.mubr.msk.f32.mxu1 %vm1937_vm1, %v1938_v13  ;;  %v1411_v17 = vld [vmem:[%s2333_s10 + $0x68] sm:$0xff] }
 0x4bb   : > { %1692 = vmatprep.subr.mxu1 %v1938_v13  ;;  %1780 = vmatpush3.bf16.msra.mxu0 %v1779_v4  ;;  %v1791_v18 = vpack.c.bf16 %v1411_v17, %v1410_v16 }
 0x4bc   : > { %1781 = vmatprep.subr.bf16.mxu0 %v1936_v10 }
 0x4bd   : > { %1685 = vmatmul.mubr.msk.f32.vlgmr.msra.gmra.mrb[8].mxu1 %vm521_vm2, %v939_v20 }
 0x4be   : > { %v1869_v22 = vpop.eup %1868  ;;  %1693 = vmatpush3.msra.mxu1 %v1107_v21  ;;  %1694 = vmatprep.mubr.msk.f32.mxu1 %vm1937_vm1, %v1938_v13 }
 0x4bf   : > { %v1105_v23 = vmul.f32 %v1869_v22, %v1861_v5  ;;  %1760 = vmatprep.subr.bf16.mxu1 %v1936_v10  ;;  %v1404_v5 = vld [vmem:[%s2333_s10 + $0x30] sm:$0xff] }
 0x4c0   : > { %v1782_v7 = vpack.c.bf16 %v1405_v6, %v1404_v5 }
 0x4c1   : > { %1695 = vmatmul.mubr.msk.f32.vlgmr.msra.gmra.mrb[10].mxu1 %vm521_vm2, %v1105_v23  ;;  %v1589_v23 = vld [vmem:[%s2329_s6] ss:$0 sm:$0xff] }
 0x4c2   : > { %1705 = vmatprep.mubr.msk.f32.mxu1 %vm1937_vm1, %v1938_v13  ;;  %1762 = vmatpush3.bf16.msra.mxu1 %v1761_v26 }
 0x4c3   : > { %1763 = vmatprep.subr.bf16.mxu1 %v1936_v10  ;;  %1783 = vmatpush3.bf16.msra.mxu0 %v1782_v7 }
 0x4c4   : > { %1784 = vmatprep.subr.bf16.mxu0 %v1936_v10 }
 0x4c6   : > { %1765 = vmatpush3.bf16.msra.mxu1 %v1764_v31 }
 0x4c7   : > { %1766 = vmatprep.subr.bf16.mxu1 %v1936_v10  ;;  %1786 = vmatpush3.bf16.msra.mxu0 %v1785_v11 }
 0x4c8   : > { %1787 = vmatprep.subr.bf16.mxu0 %v1936_v10 }
 0x4cb   : > { %1789 = vmatpush3.bf16.msra.mxu0 %v1788_v15 }
 0x4cc   : > { %1790 = vmatprep.subr.bf16.mxu0 %v1936_v10 }
 0x4cf   : > { %1792 = vmatpush3.bf16.msra.mxu0 %v1791_v18 }
 0x4d0   : > { %1793 = vmatprep.subr.bf16.mxu0 %v1936_v10 }
 0x583   : > { %v680_v27 = vpop.f32.mrb[4].mxu1 }
 0x584   : > { %v1666_v28 = vpop.f32.mrb[5].mxu1 }
 0x585   : > { %v1413_v28 = vld [vmem:[%s2333_s10 + $0x78] sm:$0xff] }
 0x58c   : > { %v846_v32 = vpop.f32.mrb[6].mxu1 }
 0x58d   : > { %1183 = vrot.lane.b32.xlu0 %v846_v32, %s1950_s15  ;;  %v1676_v33 = vpop.f32.mrb[7].mxu1 }
 0x590   : > { %v1012_v34 = vpop.f32.mrb[8].mxu1 }
 0x591   : > { %1187 = vrot.lane.b32.xlu1 %v1012_v34, %s1951_s16  ;;  %v1686_v35 = vpop.f32.mrb[9].mxu1  ;;  %s2280_s16 = scalar_lea.hbm %s2335_s12, %s1595_s0 }
 0x592   : > { %v1593_v35 = vld [vmem:[%s2334_s11] ss:$0 sm:$0xff] }
 0x594   : > { %v1178_v36 = vpop.f32.mrb[10].mxu1 }
 0x595   : > { %1191 = vrot.lane.b32.xlu0 %v1178_v36, %s1952_s17  ;;  %v1696_v37 = vpop.f32.mrb[11].mxu1  ;;  %s402_s17 = sand.u32 1, %s1926_s22  }
 0x596   : > { %s1570_s18 = sshll.u32 %s402_s17, 3  ;;  %s1494_s19 = scalar_lea.sflag [#allocation3], %s402_s17 }
 0x597   : > { %s404_s26 = scalar_lea.vmem [#allocation2], %s1570_s18  ;;  %s1953_s18 = smov [#allocation2]  }
 0x598   : > { %s1507_s28 = sshll.u32 %s404_s26, 4  ;;  %s1876_s20 = sshll.u32 %s1953_s18, 4  ;;  %s2282_s28 = int_to_ptr.vmem [resolvable:$true] %s1507_s28  ;;  %s1877_s20 = int_to_ptr.vmem [resolvable:$false] %s1876_s20 }
 0x599   : > { %s1872_s25 = scalar_lea.vmem %s2282_s28, 128  ;;  %s1878_s1 = scalar_lea.vmem %s1877_s20, 256 }
 0x59a   : > { %p1873_p11 = scmp.ne.s32.totalorder %s2282_s28, %s1872_s25  ;;  %p1879_p0 = scmp.lt.s32.totalorder %s2282_s28, %s1877_s20 }
 0x59b   : > { %p1880_p1 = scmp.lt.s32.totalorder %s1878_s1, %s1872_s25 }
 0x59c   : > { %p1874_p12 = pnand %p1873_p11, %p2057_p5 }
 0x59d   : > { %p1881_p2 = por %p1880_p1, %p1879_p0 }
 0x59e   : > { %p1875_p13 = pneg %p1874_p12 }
 0x5a0   : > { %p1882_p3 = pnand %p1881_p2, %p1875_p13 }
 0x5ff   : > { %v1184_v38 = vpop.permute.xlu0 %1183 }
 0x600   : > { %v1194_v40 = vsel %vm521_vm2, %v680_v27, %v1184_v38 }
 0x603   : > { %v1188_v39 = vpop.permute.xlu1 %1187 }
 0x604   : > { %v1196_v41 = vsel %vm1195_vm3, %v1194_v40, %v1188_v39 }
 0x607   : > { %v1192_v42 = vpop.permute.xlu0 %1191 }
 0x608   : > { %v1198_v43 = vsel %vm1197_vm4, %v1196_v41, %v1192_v42 }
 0x609   : > { %1706 = vmatmul.mubr.msk.f32.vlgmr.msra.gmra.mrb[12].mxu1 %vm412_vm0, %v1198_v43 }
 0x60a   : > { %1716 = vmatprep.mubr.msk.f32.mxu1 %vm1937_vm1, %v1938_v13 }
 0x6dc   : > { %v1279_v45 = vpop.f32.mrb[12].mxu1 }
 0x6dd   : > { %v1280_v46 = vadd.f32 %v1587_v44, %v1279_v45  ;;  %v1707_v47 = vpop.f32.mrb[13].mxu1 }
 0x6df   : > { %v2187_v48 = vadd.f32 %v1280_v46, %v2072_v0  ;;  %v1314_v0 = vld [vmem:[%s2331_s8 + $0x8] sm:$0xff] }
 0x6e0   : > { %v1767_v55 = vpack.c.bf16 %v1314_v0, %v1313_v54 }
 0x6e1   : > { %v1286_v49 = vsel %vm412_vm0, %v2187_v48, 0.0 }
 0x6e2   : > { %1287 = vadd.xlane.f32.xlu1 %v1286_v49  ;;  %1768 = vmatpush3.bf16.msra.mxu1 %v1767_v55 }
 0x6e3   : > { %1769 = vmatprep.subr.bf16.mxu1 %v1936_v10  ;;  %v1412_v10 = vld [vmem:[%s2333_s10 + $0x70] sm:$0xff] }
 0x6e4   : > { %v1794_v29 = vpack.c.bf16 %v1413_v28, %v1412_v10 }
 0x6e6   : > { %1771 = vmatpush3.bf16.msra.mxu1 %v1770_v58  ;;  %1795 = vmatpush3.bf16.msra.mxu0 %v1794_v29 }
 0x76f   : > { %v1288_v50 = vpop.xlane.xlu1 %1287 }
 0x770   : > { %v1289_v51 = vmul.f32 0.03125, %v1288_v50 }
 0x772   : > { %v1290_v52 = vsub.f32 %v2187_v48, %v1289_v51 }
 0x774   : > { %v1291_v53 = vmul.f32 %v1290_v52, %v1290_v52 }
 0x776   : > { %v1292_v13 = vsel %vm412_vm0, %v1291_v53, 0.0 }
 0x777   : > { %1293 = vadd.xlane.f32.xlu0 %v1292_v13 }
 0x804   : > { %v1294_v19 = vpop.xlane.xlu0 %1293 }
 0x805   : > { %v1295_v20 = vmul.f32 0.03125, %v1294_v19 }
 0x807   : > { %v1296_v21 = vadd.f32 1e-05, %v1295_v20 }
 0x809   : > { %1870 = vrsqrt.f32 %v1296_v21 }
 0x813   : > { %v1871_v22 = vpop.eup %1870 }
 0x814   : > { %v1298_v24 = vmul.f32 %v1871_v22, %v1290_v52 }
 0x816   : > { %v1305_v26 = vmul.f32 %v1589_v23, %v1298_v24 }
 0x818   : > { %v1312_v27 = vadd.f32 %v1590_v25, %v1305_v26 }
 0x81a   : > { %1717 = vmatmul.mubr.msk.f32.vlgmr.msra.gmra.mrb[14].mxu1 %vm412_vm0, %v1312_v27 }
 0x8ed   : > { %v1393_v31 = vpop.f32.mrb[14].mxu1 }
 0x8ee   : > { %v1394_v32 = vadd.f32 %v1591_v30, %v1393_v31  ;;  %v1718_v33 = vpop.f32.mrb[15].mxu1 }
 0x8f0   : > { %v1397_v34 = vmax.f32 %v1394_v32, 0.0 }
 0x8f2   : > { %1752 = vmatmul.mubr.f32.vlgmr.msra.gmra.mrb[6].mxu0 %v1397_v34 }
 0x9c5   : > { %v1487_v36 = vpop.f32.mrb[6].mxu0 }
 0x9c6   : > { %v1488_v37 = vadd.f32 %v1593_v35, %v1487_v36  ;;  %v1753_v38 = vpop.f32.mrb[7].mxu0 }
 0x9c8   : > { %v1491_v39 = vadd.f32 %v1488_v37, %v2187_v48 }
 0x9ca   : > { %1492 = vst.msk [vmem:[%s404_s26] sm:$0xff] %vm412_vm0, %v1491_v39 }
 0x9cb   : > { %1885 = shalt.err (!%p1882_p3)
}
 0x9cc   : > { %s1886_s17 = scalar_lea.hbm %s2280_s16, 128  ;;  %s1890_s29 = scalar_lea.hbm %s2335_s12, 256 }
 0x9cd   : > { %p1887_p4 = scmp.ne.s32.totalorder %s2280_s16, %s1886_s17  ;;  %p1891_p9 = scmp.lt.u32.totalorder %s2280_s16, %s2335_s12 }
 0x9ce   : > { %p1892_p10 = scmp.lt.u32.totalorder %s1890_s29, %s1886_s17  ;;  %p1894_p12 = scmp.lt.u32.totalorder %s1886_s17, %s2280_s16 }
 0x9cf   : > { %p1888_p7 = pnand %p1887_p4, %p2057_p5 }
 0x9d0   : > { %p1893_p11 = por %p1892_p10, %p1891_p9 }
 0x9d1   : > { %p1889_p8 = pneg %p1888_p7 }
 0x9d2   : > { %p1895_p13 = por %p1894_p12, %p1893_p11 }
 0x9d4   : > { %p1896_p0 = pnand %p1895_p13, %p1889_p8 }
 0x9d6   : > { %1899 = shalt.err (!%p1896_p0)
}
 0x9d7   : > { %1796 = dma.vmem_to_hbm [thread:$0]  (%p2057_p5), %s2282_s28, 128, %s2280_s16, %s1494_s19  }
 0x9d8 PF: > { %p1802_p1 = scmp.ge.s32.totalorder %s1934_s24, 2  ;;  %s1519_s1 = sand.u32 1, %s1922_s21  }
 0x9d9   : > { %s1520_s25 = scalar_lea.sflag [#allocation3], %s1519_s1 }
 0x9da   : > { %p1799_p2 = pnand %p1802_p1, %p2061_p6 }
 0x9dc   : > { %1917 = dma.done.wait (!%p1799_p2), %s1520_s25, 128  }
 0x9dd   : > { %1919 = vsyncadd (!%p1799_p2), %s1520_s25, 4294967168  ;;  %p22_p3 = scmp.ge.s32.totalorder %s2044_s27, 4   ;;  %s2342_s21 = smov %s1926_s22 }
 0x9de   : > { %s2343_s22 = smov %s1930_s23  ;;  %s2344_s23 = smov %s2055_s30 }
 0x9df   : > { %s2345_s24 = smov %s2044_s27  ;;  %24 = sbr.rel (!%p22_p3) target bundleno = 6 (0x6), region = 103 }
 0x9e6   :  { %1525 = vsyncpa [#allocation3], 1 }
 0x9e7   :  { %1527 = vsyncpa [#allocation3 + $0x1], 1 }

</bundles_post_ra>
